<compile_context>
chip_gen: v7x
topology: tpu7x:2x2x1
jax: 0.10.0
libtpu: 0.0.40
codegen_flags: <defaults>
</compile_context>

<pallas_src>
import functools

import jax
import jax.numpy as jnp
from jax.experimental import pallas as pl
from jax.experimental.pallas import tpu as pltpu

LANE = 128
_VMEM_CAP_BYTES = 64 << 20        # v7x physical per-TC VMEM (smallest generation)
_VMEM_SLACK_BYTES = 4 << 20       # headroom for compiler-internal scratch


def _round_up(x, m):
    return ((x + m - 1) // m) * m


# --------------------------------------------------------------------------- #
# Kernel                                                                       #
# --------------------------------------------------------------------------- #
def _gcn_fused_kernel(*refs, padded_dims):
    """refs = (a, x, w0..w5, b0..b5, out, h_scratch). Fully static 6-layer unroll."""
    n_layers = len(padded_dims) - 1
    a_ref = refs[0]
    x_ref = refs[1]
    w_refs = refs[2:2 + n_layers]
    b_refs = refs[2 + n_layers:2 + 2 * n_layers]
    o_ref = refs[2 + 2 * n_layers]
    h_ref = refs[2 + 2 * n_layers + 1]                    # (N, max_w) bf16 scratch

    a = a_ref[...]                                        # (N, N) bf16

    for li in range(n_layers):
        f_in, f_out = padded_dims[li], padded_dims[li + 1]
        if li == 0:
            h_in = x_ref[...]                             # (N, f_in) bf16
        else:
            h_in = h_ref[:, :f_in]                        # bf16, static lane-aligned slice
        w = w_refs[li][...]                               # (f_in, f_out) bf16

        if f_out > f_in:
            # widening layer: aggregate first over the narrower feature width
            ah = jnp.dot(a, h_in, preferred_element_type=jnp.float32)
            z = jnp.dot(ah.astype(jnp.bfloat16), w,
                        preferred_element_type=jnp.float32)
        else:
            hw = jnp.dot(h_in, w, preferred_element_type=jnp.float32)
            z = jnp.dot(a, hw.astype(jnp.bfloat16),
                        preferred_element_type=jnp.float32)

        z = z + b_refs[li][...]                           # (1, f_out) f32 bias

        if li < n_layers - 1:
            # relu, store back to the bf16 activation scratch (stays in VMEM)
            h_ref[:, :f_out] = jnp.maximum(z, 0.0).astype(jnp.bfloat16)
        else:
            o_ref[...] = z.astype(o_ref.dtype)            # logits, no relu


# --------------------------------------------------------------------------- #
# One-time operand prep (outside the per-call hot path)                        #
# --------------------------------------------------------------------------- #
def pad_gcn_inputs(a_hat, x, params):
    """Cast/pad operands to lane-dense bf16/f32 once, at setup time."""
    n = x.shape[0]
    true_dims = [x.shape[1]] + [w.shape[1] for (w, _) in params]
    padded_dims = tuple(_round_up(d, LANE) for d in true_dims)

    a_bf = a_hat.astype(jnp.bfloat16)

    x_pad = jnp.zeros((n, padded_dims[0]), jnp.bfloat16)
    x_pad = x_pad.at[:, :true_dims[0]].set(x.astype(jnp.bfloat16))

    w_pads, b_pads = [], []
    for li, (w, b) in enumerate(params):
        f_in_p, f_out_p = padded_dims[li], padded_dims[li + 1]
        w_p = jnp.zeros((f_in_p, f_out_p), jnp.bfloat16)
        w_p = w_p.at[:w.shape[0], :w.shape[1]].set(w.astype(jnp.bfloat16))
        b_p = jnp.zeros((1, f_out_p), jnp.float32)
        b_p = b_p.at[0, :b.shape[0]].set(b.astype(jnp.float32))
        w_pads.append(w_p)
        b_pads.append(b_p)

    return a_bf, x_pad, tuple(w_pads), tuple(b_pads)


# --------------------------------------------------------------------------- #
# Forward (jitted; expects already-padded operands)                            #
# --------------------------------------------------------------------------- #
@functools.partial(jax.jit, static_argnames=("num_classes",))
def gcn_forward(a_bf, x_pad, w_pads, b_pads, num_classes):
    """Fused 6-layer GCN forward: relu(A@X@W1+b1) ... A@H@W6+b6, one pallas_call."""
    n = x_pad.shape[0]
    n_layers = len(w_pads)
    padded_dims = (x_pad.shape[1],) + tuple(w.shape[1] for w in w_pads)
    max_w = max(padded_dims)

    # ---- VMEM budget (everything is whole-array resident, no double buffering) ----
    weight_bytes = sum(2 * fi * fo for fi, fo in zip(padded_dims[:-1], padded_dims[1:]))
    bias_bytes = sum(4 * fo for fo in padded_dims[1:])
    vmem_bytes = (2 * n * n                      # A_hat (bf16)
                  + 2 * n * padded_dims[0]       # X (bf16)
                  + weight_bytes + bias_bytes
                  + 4 * n * padded_dims[-1]      # logits out (f32)
                  + 2 * n * max_w)               # H scratch (bf16)
    if vmem_bytes + _VMEM_SLACK_BYTES > _VMEM_CAP_BYTES:
        # TODO(synk): switch to the row-tiled grid (A streamed in >=256-row tiles,
        # "parallel" row axis) once graphs exceed the whole-VMEM-resident cap.
        raise NotImplementedError(
            f"GCN fused kernel needs ~{vmem_bytes >> 20} MiB VMEM; exceeds the "
            f"{_VMEM_CAP_BYTES >> 20} MiB v7x budget. Row-tiled variant required.")
    vmem_limit = _round_up(vmem_bytes + _VMEM_SLACK_BYTES, 1 << 20)

    # ---- cost estimate (matmul reassociation mirrored) ----
    flops = 0
    for fi, fo in zip(padded_dims[:-1], padded_dims[1:]):
        flops += 2 * n * n * min(fi, fo) + 2 * n * fi * fo
    bytes_accessed = (2 * n * n + 2 * n * padded_dims[0] + weight_bytes + bias_bytes
                      + 4 * n * padded_dims[-1])
    cost = pl.CostEstimate(flops=int(flops), transcendentals=0,
                           bytes_accessed=int(bytes_accessed))

    kernel = functools.partial(_gcn_fused_kernel, padded_dims=padded_dims)
    vmem = pltpu.MemorySpace.VMEM
    n_in = 2 + 2 * n_layers

    out_pad = pl.pallas_call(
        kernel,
        out_shape=jax.ShapeDtypeStruct((n, padded_dims[-1]), jnp.float32),
        in_specs=[pl.BlockSpec(memory_space=vmem)] * n_in,
        out_specs=pl.BlockSpec(memory_space=vmem),
        scratch_shapes=[pltpu.VMEM((n, max_w), jnp.bfloat16)],
        compiler_params=pltpu.CompilerParams(vmem_limit_bytes=int(vmem_limit)),
        cost_estimate=cost,
    )(a_bf, x_pad, *w_pads, *b_pads)

    return out_pad[:, :num_classes]


# --------------------------------------------------------------------------- #
# Pure-JAX reference mirroring the kernel's bf16/f32 math (no Pallas)          #
# --------------------------------------------------------------------------- #
def gcn_forward_ref(a_bf, x_pad, w_pads, b_pads, num_classes):
    n_layers = len(w_pads)
    padded_dims = (x_pad.shape[1],) + tuple(w.shape[1] for w in w_pads)

    h = x_pad
    out = None
    for li in range(n_layers):
        f_in_p, f_out_p = padded_dims[li], padded_dims[li + 1]
        w_p, b_p = w_pads[li], b_pads[li]
        if f_out_p > f_in_p:
            ah = jnp.dot(a_bf, h, preferred_element_type=jnp.float32)
            z = jnp.dot(ah.astype(jnp.bfloat16), w_p,
                        preferred_element_type=jnp.float32)
        else:
            hw = jnp.dot(h, w_p, preferred_element_type=jnp.float32)
            z = jnp.dot(a_bf, hw.astype(jnp.bfloat16),
                        preferred_element_type=jnp.float32)
        z = z + b_p
        if li < n_layers - 1:
            h = jnp.maximum(z, 0.0).astype(jnp.bfloat16)
        else:
            out = z
    return out[:, :num_classes]


# --------------------------------------------------------------------------- #
# Deterministic setup helpers                                                  #
# --------------------------------------------------------------------------- #
def init_gcn_params(key, in_feats, num_classes):
    """Deterministic Glorot-style init for the 6 GraphConv layers."""
    dims = [in_feats, 128, 256, 64, 32, 8, num_classes]
    params = []
    for li in range(6):
        f_in, f_out = dims[li], dims[li + 1]
        key, wk = jax.random.split(key)
        scale = jnp.sqrt(6.0 / (f_in + f_out))
        w = jax.random.uniform(wk, (f_in, f_out), jnp.float32, -scale, scale)
        b = jnp.zeros((f_out,), jnp.float32)
        params.append((w, b))
    return params


def build_normalized_adj(key, n):
    """Random undirected graph with self-loops, symmetrically normalized."""
    logits = jax.random.uniform(key, (n, n))
    adj = (logits + logits.T > 1.0).astype(jnp.float32)
    adj = adj + jnp.eye(n, dtype=jnp.float32)            # self-loops
    adj = jnp.minimum(adj, 1.0)
    deg = jnp.sum(adj, axis=1)
    d_inv_sqrt = 1.0 / jnp.sqrt(deg)
    return adj * d_inv_sqrt[:, None] * d_inv_sqrt[None, :]


if __name__ == "__main__":
    key = jax.random.PRNGKey(0)
    k_adj, k_feat, k_param = jax.random.split(key, 3)

    n_nodes = 16
    in_feats = 32
    num_classes = 4

    a_hat = build_normalized_adj(k_adj, n_nodes)                      # (N, N)
    x = jax.random.normal(k_feat, (n_nodes, in_feats), jnp.float32)   # (N, F_in)
    params = init_gcn_params(k_param, in_feats, num_classes)

    # One-time operand prep (outside the per-call hot path).
    a_bf, x_pad, w_pads, b_pads = pad_gcn_inputs(a_hat, x, params)
    jax.block_until_ready((a_bf, x_pad, w_pads, b_pads))

    out = gcn_forward(a_bf, x_pad, w_pads, b_pads, num_classes=num_classes)  # (N, C)
    jax.block_until_ready(out)

    ref = gcn_forward_ref(a_bf, x_pad, w_pads, b_pads, num_classes)
    jax.block_until_ready(ref)

    assert out.shape == (n_nodes, num_classes)
    assert bool(jnp.all(jnp.isfinite(out)))
    assert bool(jnp.allclose(out, ref, rtol=5e-2, atol=5e-2))
    print("KERNEL_OK")
</pallas_src>

<mosaic_0001>
module attributes {stable_mosaic.version = 11 : i64} {
  func.func @_gcn_fused_kernel(%arg0: memref<16x16xbf16, #tpu.memory_space<vmem>>, %arg1: memref<16x128xbf16, #tpu.memory_space<vmem>>, %arg2: memref<128x128xbf16, #tpu.memory_space<vmem>>, %arg3: memref<128x256xbf16, #tpu.memory_space<vmem>>, %arg4: memref<256x128xbf16, #tpu.memory_space<vmem>>, %arg5: memref<128x128xbf16, #tpu.memory_space<vmem>>, %arg6: memref<128x128xbf16, #tpu.memory_space<vmem>>, %arg7: memref<128x128xbf16, #tpu.memory_space<vmem>>, %arg8: memref<1x128xf32, #tpu.memory_space<vmem>>, %arg9: memref<1x256xf32, #tpu.memory_space<vmem>>, %arg10: memref<1x128xf32, #tpu.memory_space<vmem>>, %arg11: memref<1x128xf32, #tpu.memory_space<vmem>>, %arg12: memref<1x128xf32, #tpu.memory_space<vmem>>, %arg13: memref<1x128xf32, #tpu.memory_space<vmem>>, %arg14: memref<16x128xf32, #tpu.memory_space<vmem>>, %arg15: memref<16x256xbf16, #tpu.memory_space<vmem>>) attributes {dimension_semantics = [], scalar_prefetch = 0 : i64, scratch_operands = 1 : i64, tpu.core_type = #tpu.core_type<tc>} {
    %c0 = arith.constant 0 : index
    %c0_0 = arith.constant 0 : index
    %0 = vector.load %arg0[%c0, %c0_0] : memref<16x16xbf16, #tpu.memory_space<vmem>>, vector<16x16xbf16>
    %c0_1 = arith.constant 0 : index
    %c0_2 = arith.constant 0 : index
    %1 = vector.load %arg1[%c0_1, %c0_2] : memref<16x128xbf16, #tpu.memory_space<vmem>>, vector<16x128xbf16>
    %c0_3 = arith.constant 0 : index
    %c0_4 = arith.constant 0 : index
    %2 = vector.load %arg2[%c0_3, %c0_4] : memref<128x128xbf16, #tpu.memory_space<vmem>>, vector<128x128xbf16>
    %cst = arith.constant dense<0.000000e+00> : vector<16x128xf32>
    %3 = tpu.matmul %1, %2, %cst {dimension_numbers = #tpu.dot_dimension_numbers<[1], [0], [0], [1], [0, 0, 1, 1], [], []>} : vector<16x128xbf16>, vector<128x128xbf16>, vector<16x128xf32> -> vector<16x128xf32>
    %4 = arith.truncf %3 : vector<16x128xf32> to vector<16x128xbf16>
    %cst_5 = arith.constant dense<0.000000e+00> : vector<16x128xf32>
    %5 = tpu.matmul %0, %4, %cst_5 {dimension_numbers = #tpu.dot_dimension_numbers<[1], [0], [0], [1], [0, 0, 1, 1], [], []>} : vector<16x16xbf16>, vector<16x128xbf16>, vector<16x128xf32> -> vector<16x128xf32>
    %c0_6 = arith.constant 0 : index
    %c0_7 = arith.constant 0 : index
    %6 = vector.load %arg8[%c0_6, %c0_7] : memref<1x128xf32, #tpu.memory_space<vmem>>, vector<1x128xf32>
    %7 = vector.broadcast %6 : vector<1x128xf32> to vector<16x128xf32>
    %8 = arith.addf %5, %7 : vector<16x128xf32>
    %cst_8 = arith.constant 0.000000e+00 : f32
    %9 = vector.broadcast %cst_8 : f32 to vector<16x128xf32>
    %10 = arith.maximumf %8, %9 : vector<16x128xf32>
    %11 = arith.truncf %10 : vector<16x128xf32> to vector<16x128xbf16>
    %c0_9 = arith.constant 0 : index
    %c0_10 = arith.constant 0 : index
    %12 = vector.load %arg15[%c0_9, %c0_10] : memref<16x256xbf16, #tpu.memory_space<vmem>>, vector<16x128xbf16>
    tpu.vector_store %arg15[%c0_9, %c0_10], %11 {strides = array<i32>} : memref<16x256xbf16, #tpu.memory_space<vmem>>, vector<16x128xbf16>,
    %c0_11 = arith.constant 0 : index
    %c0_12 = arith.constant 0 : index
    %13 = vector.load %arg15[%c0_11, %c0_12] : memref<16x256xbf16, #tpu.memory_space<vmem>>, vector<16x128xbf16>
    %c0_13 = arith.constant 0 : index
    %c0_14 = arith.constant 0 : index
    %14 = vector.load %arg3[%c0_13, %c0_14] : memref<128x256xbf16, #tpu.memory_space<vmem>>, vector<128x256xbf16>
    %cst_15 = arith.constant dense<0.000000e+00> : vector<16x128xf32>
    %15 = tpu.matmul %0, %13, %cst_15 {dimension_numbers = #tpu.dot_dimension_numbers<[1], [0], [0], [1], [0, 0, 1, 1], [], []>} : vector<16x16xbf16>, vector<16x128xbf16>, vector<16x128xf32> -> vector<16x128xf32>
    %16 = arith.truncf %15 : vector<16x128xf32> to vector<16x128xbf16>
    %cst_16 = arith.constant dense<0.000000e+00> : vector<16x256xf32>
    %17 = tpu.matmul %16, %14, %cst_16 {dimension_numbers = #tpu.dot_dimension_numbers<[1], [0], [0], [1], [0, 0, 1, 1], [], []>} : vector<16x128xbf16>, vector<128x256xbf16>, vector<16x256xf32> -> vector<16x256xf32>
    %c0_17 = arith.constant 0 : index
    %c0_18 = arith.constant 0 : index
    %18 = vector.load %arg9[%c0_17, %c0_18] : memref<1x256xf32, #tpu.memory_space<vmem>>, vector<1x256xf32>
    %19 = vector.broadcast %18 : vector<1x256xf32> to vector<16x256xf32>
    %20 = arith.addf %17, %19 : vector<16x256xf32>
    %cst_19 = arith.constant 0.000000e+00 : f32
    %21 = vector.broadcast %cst_19 : f32 to vector<16x256xf32>
    %22 = arith.maximumf %20, %21 : vector<16x256xf32>
    %23 = arith.truncf %22 : vector<16x256xf32> to vector<16x256xbf16>
    %c0_20 = arith.constant 0 : index
    %c0_21 = arith.constant 0 : index
    %24 = vector.load %arg15[%c0_20, %c0_21] : memref<16x256xbf16, #tpu.memory_space<vmem>>, vector<16x256xbf16>
    tpu.vector_store %arg15[%c0_20, %c0_21], %23 {strides = array<i32>} : memref<16x256xbf16, #tpu.memory_space<vmem>>, vector<16x256xbf16>,
    %c0_22 = arith.constant 0 : index
    %c0_23 = arith.constant 0 : index
    %25 = vector.load %arg15[%c0_22, %c0_23] : memref<16x256xbf16, #tpu.memory_space<vmem>>, vector<16x256xbf16>
    %c0_24 = arith.constant 0 : index
    %c0_25 = arith.constant 0 : index
    %26 = vector.load %arg4[%c0_24, %c0_25] : memref<256x128xbf16, #tpu.memory_space<vmem>>, vector<256x128xbf16>
    %cst_26 = arith.constant dense<0.000000e+00> : vector<16x128xf32>
    %27 = tpu.matmul %25, %26, %cst_26 {dimension_numbers = #tpu.dot_dimension_numbers<[1], [0], [0], [1], [0, 0, 1, 1], [], []>} : vector<16x256xbf16>, vector<256x128xbf16>, vector<16x128xf32> -> vector<16x128xf32>
    %28 = arith.truncf %27 : vector<16x128xf32> to vector<16x128xbf16>
    %cst_27 = arith.constant dense<0.000000e+00> : vector<16x128xf32>
    %29 = tpu.matmul %0, %28, %cst_27 {dimension_numbers = #tpu.dot_dimension_numbers<[1], [0], [0], [1], [0, 0, 1, 1], [], []>} : vector<16x16xbf16>, vector<16x128xbf16>, vector<16x128xf32> -> vector<16x128xf32>
    %c0_28 = arith.constant 0 : index
    %c0_29 = arith.constant 0 : index
    %30 = vector.load %arg10[%c0_28, %c0_29] : memref<1x128xf32, #tpu.memory_space<vmem>>, vector<1x128xf32>
    %31 = vector.broadcast %30 : vector<1x128xf32> to vector<16x128xf32>
    %32 = arith.addf %29, %31 : vector<16x128xf32>
    %cst_30 = arith.constant 0.000000e+00 : f32
    %33 = vector.broadcast %cst_30 : f32 to vector<16x128xf32>
    %34 = arith.maximumf %32, %33 : vector<16x128xf32>
    %35 = arith.truncf %34 : vector<16x128xf32> to vector<16x128xbf16>
    %c0_31 = arith.constant 0 : index
    %c0_32 = arith.constant 0 : index
    %36 = vector.load %arg15[%c0_31, %c0_32] : memref<16x256xbf16, #tpu.memory_space<vmem>>, vector<16x128xbf16>
    tpu.vector_store %arg15[%c0_31, %c0_32], %35 {strides = array<i32>} : memref<16x256xbf16, #tpu.memory_space<vmem>>, vector<16x128xbf16>,
    %c0_33 = arith.constant 0 : index
    %c0_34 = arith.constant 0 : index
    %37 = vector.load %arg15[%c0_33, %c0_34] : memref<16x256xbf16, #tpu.memory_space<vmem>>, vector<16x128xbf16>
    %c0_35 = arith.constant 0 : index
    %c0_36 = arith.constant 0 : index
    %38 = vector.load %arg5[%c0_35, %c0_36] : memref<128x128xbf16, #tpu.memory_space<vmem>>, vector<128x128xbf16>
    %cst_37 = arith.constant dense<0.000000e+00> : vector<16x128xf32>
    %39 = tpu.matmul %37, %38, %cst_37 {dimension_numbers = #tpu.dot_dimension_numbers<[1], [0], [0], [1], [0, 0, 1, 1], [], []>} : vector<16x128xbf16>, vector<128x128xbf16>, vector<16x128xf32> -> vector<16x128xf32>
    %40 = arith.truncf %39 : vector<16x128xf32> to vector<16x128xbf16>
    %cst_38 = arith.constant dense<0.000000e+00> : vector<16x128xf32>
    %41 = tpu.matmul %0, %40, %cst_38 {dimension_numbers = #tpu.dot_dimension_numbers<[1], [0], [0], [1], [0, 0, 1, 1], [], []>} : vector<16x16xbf16>, vector<16x128xbf16>, vector<16x128xf32> -> vector<16x128xf32>
    %c0_39 = arith.constant 0 : index
    %c0_40 = arith.constant 0 : index
    %42 = vector.load %arg11[%c0_39, %c0_40] : memref<1x128xf32, #tpu.memory_space<vmem>>, vector<1x128xf32>
    %43 = vector.broadcast %42 : vector<1x128xf32> to vector<16x128xf32>
    %44 = arith.addf %41, %43 : vector<16x128xf32>
    %cst_41 = arith.constant 0.000000e+00 : f32
    %45 = vector.broadcast %cst_41 : f32 to vector<16x128xf32>
    %46 = arith.maximumf %44, %45 : vector<16x128xf32>
    %47 = arith.truncf %46 : vector<16x128xf32> to vector<16x128xbf16>
    %c0_42 = arith.constant 0 : index
    %c0_43 = arith.constant 0 : index
    %48 = vector.load %arg15[%c0_42, %c0_43] : memref<16x256xbf16, #tpu.memory_space<vmem>>, vector<16x128xbf16>
    tpu.vector_store %arg15[%c0_42, %c0_43], %47 {strides = array<i32>} : memref<16x256xbf16, #tpu.memory_space<vmem>>, vector<16x128xbf16>,
    %c0_44 = arith.constant 0 : index
    %c0_45 = arith.constant 0 : index
    %49 = vector.load %arg15[%c0_44, %c0_45] : memref<16x256xbf16, #tpu.memory_space<vmem>>, vector<16x128xbf16>
    %c0_46 = arith.constant 0 : index
    %c0_47 = arith.constant 0 : index
    %50 = vector.load %arg6[%c0_46, %c0_47] : memref<128x128xbf16, #tpu.memory_space<vmem>>, vector<128x128xbf16>
    %cst_48 = arith.constant dense<0.000000e+00> : vector<16x128xf32>
    %51 = tpu.matmul %49, %50, %cst_48 {dimension_numbers = #tpu.dot_dimension_numbers<[1], [0], [0], [1], [0, 0, 1, 1], [], []>} : vector<16x128xbf16>, vector<128x128xbf16>, vector<16x128xf32> -> vector<16x128xf32>
    %52 = arith.truncf %51 : vector<16x128xf32> to vector<16x128xbf16>
    %cst_49 = arith.constant dense<0.000000e+00> : vector<16x128xf32>
    %53 = tpu.matmul %0, %52, %cst_49 {dimension_numbers = #tpu.dot_dimension_numbers<[1], [0], [0], [1], [0, 0, 1, 1], [], []>} : vector<16x16xbf16>, vector<16x128xbf16>, vector<16x128xf32> -> vector<16x128xf32>
    %c0_50 = arith.constant 0 : index
    %c0_51 = arith.constant 0 : index
    %54 = vector.load %arg12[%c0_50, %c0_51] : memref<1x128xf32, #tpu.memory_space<vmem>>, vector<1x128xf32>
    %55 = vector.broadcast %54 : vector<1x128xf32> to vector<16x128xf32>
    %56 = arith.addf %53, %55 : vector<16x128xf32>
    %cst_52 = arith.constant 0.000000e+00 : f32
    %57 = vector.broadcast %cst_52 : f32 to vector<16x128xf32>
    %58 = arith.maximumf %56, %57 : vector<16x128xf32>
    %59 = arith.truncf %58 : vector<16x128xf32> to vector<16x128xbf16>
    %c0_53 = arith.constant 0 : index
    %c0_54 = arith.constant 0 : index
    %60 = vector.load %arg15[%c0_53, %c0_54] : memref<16x256xbf16, #tpu.memory_space<vmem>>, vector<16x128xbf16>
    tpu.vector_store %arg15[%c0_53, %c0_54], %59 {strides = array<i32>} : memref<16x256xbf16, #tpu.memory_space<vmem>>, vector<16x128xbf16>,
    %c0_55 = arith.constant 0 : index
    %c0_56 = arith.constant 0 : index
    %61 = vector.load %arg15[%c0_55, %c0_56] : memref<16x256xbf16, #tpu.memory_space<vmem>>, vector<16x128xbf16>
    %c0_57 = arith.constant 0 : index
    %c0_58 = arith.constant 0 : index
    %62 = vector.load %arg7[%c0_57, %c0_58] : memref<128x128xbf16, #tpu.memory_space<vmem>>, vector<128x128xbf16>
    %cst_59 = arith.constant dense<0.000000e+00> : vector<16x128xf32>
    %63 = tpu.matmul %61, %62, %cst_59 {dimension_numbers = #tpu.dot_dimension_numbers<[1], [0], [0], [1], [0, 0, 1, 1], [], []>} : vector<16x128xbf16>, vector<128x128xbf16>, vector<16x128xf32> -> vector<16x128xf32>
    %64 = arith.truncf %63 : vector<16x128xf32> to vector<16x128xbf16>
    %cst_60 = arith.constant dense<0.000000e+00> : vector<16x128xf32>
    %65 = tpu.matmul %0, %64, %cst_60 {dimension_numbers = #tpu.dot_dimension_numbers<[1], [0], [0], [1], [0, 0, 1, 1], [], []>} : vector<16x16xbf16>, vector<16x128xbf16>, vector<16x128xf32> -> vector<16x128xf32>
    %c0_61 = arith.constant 0 : index
    %c0_62 = arith.constant 0 : index
    %66 = vector.load %arg13[%c0_61, %c0_62] : memref<1x128xf32, #tpu.memory_space<vmem>>, vector<1x128xf32>
    %67 = vector.broadcast %66 : vector<1x128xf32> to vector<16x128xf32>
    %68 = arith.addf %65, %67 : vector<16x128xf32>
    %c0_63 = arith.constant 0 : index
    %c0_64 = arith.constant 0 : index
    %69 = vector.load %arg14[%c0_63, %c0_64] : memref<16x128xf32, #tpu.memory_space<vmem>>, vector<16x128xf32>
    tpu.vector_store %arg14[%c0_63, %c0_64], %68 {strides = array<i32>} : memref<16x128xf32, #tpu.memory_space<vmem>>, vector<16x128xf32>,
    return
  }
}

</mosaic_0001>

<bundles_post_ra>
// kernel: gcn_forward.1
= control target key start
LH: loop header
LB: loop body
LE: loop exit
PB: predicated region body
PF: predicated region fallthrough
CT: control target
= control target key end

     0   :  { %19 = vsyncpa [#allocation4], 0  ;;  %s2113_s0 = inlined_call_operand.hbm [shape: bf16[16,16], index: 0, kind: input, shape index: {}]   ;;  %s2114_s1 = inlined_call_operand.hbm [shape: bf16[16,128], index: 1, kind: input, shape index: {}]   ;;  %s2115_s2 = inlined_call_operand.hbm [shape: bf16[128,128], index: 2, kind: input, shape index: {}]   ;;  %s2116_s3 = inlined_call_operand.hbm [shape: bf16[128,256], index: 3, kind: input, shape index: {}]   ;;  %s2117_s4 = inlined_call_operand.hbm [shape: bf16[256,128], index: 4, kind: input, shape index: {}]   ;;  %s2118_s5 = inlined_call_operand.hbm [shape: bf16[128,128], index: 5, kind: input, shape index: {}]   ;;  %s2119_s6 = inlined_call_operand.hbm [shape: bf16[128,128], index: 6, kind: input, shape index: {}]   ;;  %s2120_s7 = inlined_call_operand.hbm [shape: bf16[128,128], index: 7, kind: input, shape index: {}]   ;;  %s2121_s8 = inlined_call_operand.vmem [shape: f32[1,128], index: 8, kind: input, shape index: {}]   ;;  %s2122_s9 = inlined_call_operand.vmem [shape: f32[1,256], index: 9, kind: input, shape index: {}]   ;;  %s2123_s10 = inlined_call_operand.vmem [shape: f32[1,128], index: 10, kind: input, shape index: {}]   ;;  %s2124_s11 = inlined_call_operand.vmem [shape: f32[1,128], index: 11, kind: input, shape index: {}]   ;;  %s2125_s12 = inlined_call_operand.vmem [shape: f32[1,128], index: 12, kind: input, shape index: {}]   ;;  %s2126_s13 = inlined_call_operand.vmem [shape: f32[1,128], index: 13, kind: input, shape index: {}]   ;;  %s2127_s14 = inlined_call_operand.vmem [shape: f32[16,128], index: 14, kind: output, shape index: {}]  }
   0x1   :  { %20 = vsyncpa [#allocation6], 0 }
   0x2   :  { %21 = vsyncpa [#allocation9], 0 }
   0x3   :  { %22 = vsyncpa [#allocation12], 0 }
   0x4   :  { %23 = vsyncpa [#allocation15], 0  ;;  %s1782_s29 = smov [#allocation5]   ;;  %s1783_s15 = smov [#allocation8]  }
   0x5   :  { %s41_s30 = sshll.u32 %s1782_s29, 4  ;;  %s65_s16 = sshll.u32 %s1783_s15, 4  ;;  %s42_s30 = int_to_ptr.vmem [resolvable:$true] %s41_s30  ;;  %s1872_s16 = int_to_ptr.vmem [resolvable:$true] %s65_s16 }
   0x6   :  { %s1596_s19 = scalar_lea.hbm %s2114_s1, 128 }
   0x7   :  { %p1597_p0 = scmp.ne.s32.totalorder %s2114_s1, %s1596_s19  ;;  %p1600_p1 = scmp.lt.u32.totalorder %s1596_s19, %s2114_s1 }
   0x9   :  { %p1602_p2 = pnand %p1600_p1, %p1597_p0 }
   0xb   :  { %1605 = shalt.err (!%p1602_p2)
}
   0xc   :  { %s1606_s24 = scalar_lea.vmem %s42_s30, 128  ;;  %p1611_p4 = scmp.lt.s32.totalorder %s42_s30, %s42_s30 }
   0xd   :  { %p1607_p3 = scmp.ne.s32.totalorder %s42_s30, %s1606_s24  ;;  %p1612_p5 = scmp.lt.s32.totalorder %s1606_s24, %s1606_s24 }
   0xf   :  { %p1613_p6 = por %p1612_p5, %p1611_p4 }
  0x11   :  { %p1614_p7 = pnand %p1613_p6, %p1607_p3 }
  0x13   :  { %1617 = shalt.err (!%p1614_p7)
}
  0x14   :  { %s2128_s25 = smov 64   ;;  %s1785_s26 = smov 4  }
  0x15   :  { %47 = dma.hbm_to_vmem [thread:$0]  %s2114_s1, 128, %s42_s30, [#allocation6], %s2128_s25, %s2128_s25, %s1785_s26  }
  0x16   :  { %s1618_s17 = scalar_lea.hbm %s2116_s3, 2048 }
  0x17   :  { %p1619_p8 = scmp.ne.s32.totalorder %s2116_s3, %s1618_s17  ;;  %p1622_p9 = scmp.lt.u32.totalorder %s1618_s17, %s2116_s3 }
  0x19   :  { %p1624_p10 = pnand %p1622_p9, %p1619_p8 }
  0x1b   :  { %1627 = shalt.err (!%p1624_p10)
}
  0x1c   :  { %s1628_s22 = scalar_lea.vmem %s1872_s16, 2048  ;;  %p1633_p12 = scmp.lt.s32.totalorder %s1872_s16, %s1872_s16 }
  0x1d   :  { %p1629_p11 = scmp.ne.s32.totalorder %s1872_s16, %s1628_s22  ;;  %p1634_p13 = scmp.lt.s32.totalorder %s1628_s22, %s1628_s22 }
  0x1f   :  { %p1635_p0 = por %p1634_p13, %p1633_p12 }
  0x21   :  { %p1636_p1 = pnand %p1635_p0, %p1629_p11 }
  0x23   :  { %1639 = shalt.err (!%p1636_p1)
}
  0x24   :  { %s1786_s1 = smov 128   ;;  %s1787_s30 = smov 8  }
  0x25   :  { %71 = dma.hbm_to_vmem [thread:$0]  %s2116_s3, 2048, %s1872_s16, [#allocation9], %s1786_s1, %s1786_s1, %s1787_s30  }
  0x26   :  { %s1788_s27 = smov [#allocation11]   ;;  %s1789_s29 = smov [#allocation3]  }
  0x27   :  { %s89_s28 = sshll.u32 %s1788_s27, 4  ;;  %s29_s15 = sshll.u32 %s1789_s29, 4  ;;  %s90_s28 = int_to_ptr.vmem [resolvable:$true] %s89_s28  ;;  %s1906_s15 = int_to_ptr.vmem [resolvable:$true] %s29_s15 }
  0x28   :  { %s1640_s19 = scalar_lea.hbm %s2118_s5, 1024 }
  0x29   :  { %p1641_p2 = scmp.ne.s32.totalorder %s2118_s5, %s1640_s19  ;;  %p1644_p3 = scmp.lt.u32.totalorder %s1640_s19, %s2118_s5 }
  0x2b   :  { %p1646_p4 = pnand %p1644_p3, %p1641_p2 }
  0x2d   :  { %1649 = shalt.err (!%p1646_p4)
}
  0x2e   :  { %s1650_s3 = scalar_lea.vmem %s90_s28, 1024  ;;  %p1655_p6 = scmp.lt.s32.totalorder %s90_s28, %s90_s28 }
  0x2f   :  { %p1651_p5 = scmp.ne.s32.totalorder %s90_s28, %s1650_s3  ;;  %p1656_p7 = scmp.lt.s32.totalorder %s1650_s3, %s1650_s3 }
  0x31   :  { %p1657_p8 = por %p1656_p7, %p1655_p6 }
  0x33   :  { %p1658_p9 = pnand %p1657_p8, %p1651_p5 }
  0x35   :  { %1661 = shalt.err (!%p1658_p9)
}
  0x36   :  { %s2130_s16 = smov 64   ;;  %s1662_s25 = scalar_lea.hbm %s2113_s0, 128 }
  0x37   :  { %95 = dma.hbm_to_vmem [thread:$0]  %s2118_s5, 1024, %s90_s28, [#allocation12], %s2130_s16, %s2130_s16, %s1785_s26  }
  0x38   :  { %p1663_p10 = scmp.ne.s32.totalorder %s2113_s0, %s1662_s25  ;;  %p1666_p11 = scmp.lt.u32.totalorder %s1662_s25, %s2113_s0 }
  0x3a   :  { %p1668_p12 = pnand %p1666_p11, %p1663_p10 }
  0x3c   :  { %1671 = shalt.err (!%p1668_p12)
}
  0x3d   :  { %s1672_s19 = scalar_lea.vmem %s1906_s15, 128  ;;  %p1677_p0 = scmp.lt.s32.totalorder %s1906_s15, %s1906_s15 }
  0x3e   :  { %p1673_p13 = scmp.ne.s32.totalorder %s1906_s15, %s1672_s19  ;;  %p1678_p1 = scmp.lt.s32.totalorder %s1672_s19, %s1672_s19 }
  0x40   :  { %p1679_p2 = por %p1678_p1, %p1677_p0 }
  0x42   :  { %p1680_p3 = pnand %p1679_p2, %p1673_p13 }
  0x44   :  { %1683 = shalt.err (!%p1680_p3)
}
  0x45   :  { %35 = dma.hbm_to_vmem [thread:$0]  %s2113_s0, 128, %s1906_s15, [#allocation4], %s2130_s16, %s2130_s16, %s1785_s26  }
  0x46   :  { %s1790_s20 = smov [#allocation7]   ;;  %s1791_s22 = smov [#allocation10]  }
  0x47   :  { %s53_s21 = sshll.u32 %s1790_s20, 4  ;;  %s77_s3 = sshll.u32 %s1791_s22, 4  ;;  %s54_s21 = int_to_ptr.vmem [resolvable:$true] %s53_s21  ;;  %s1943_s3 = int_to_ptr.vmem [resolvable:$true] %s77_s3 }
  0x48   :  { %s1684_s23 = scalar_lea.hbm %s2115_s2, 1024 }
  0x49   :  { %p1685_p4 = scmp.ne.s32.totalorder %s2115_s2, %s1684_s23  ;;  %p1688_p5 = scmp.lt.u32.totalorder %s1684_s23, %s2115_s2 }
  0x4b   :  { %p1690_p6 = pnand %p1688_p5, %p1685_p4 }
  0x4d   :  { %1693 = shalt.err (!%p1690_p6)
}
  0x4e   :  { %s1694_s0 = scalar_lea.vmem %s54_s21, 1024  ;;  %p1699_p8 = scmp.lt.s32.totalorder %s54_s21, %s54_s21 }
  0x4f   :  { %p1695_p7 = scmp.ne.s32.totalorder %s54_s21, %s1694_s0  ;;  %p1700_p9 = scmp.lt.s32.totalorder %s1694_s0, %s1694_s0 }
  0x51   :  { %p1701_p10 = por %p1700_p9, %p1699_p8 }
  0x53   :  { %p1702_p11 = pnand %p1701_p10, %p1695_p7 }
  0x55   :  { %1705 = shalt.err (!%p1702_p11)
}
  0x56   :  { %59 = dma.hbm_to_vmem [thread:$0]  %s2115_s2, 1024, %s54_s21, [#allocation6], %s2130_s16, %s2130_s16, %s1785_s26  }
  0x57   :  { %s1706_s5 = scalar_lea.hbm %s2117_s4, 2048 }
  0x58   :  { %p1707_p12 = scmp.ne.s32.totalorder %s2117_s4, %s1706_s5  ;;  %p1710_p13 = scmp.lt.u32.totalorder %s1706_s5, %s2117_s4 }
  0x5a   :  { %p1712_p0 = pnand %p1710_p13, %p1707_p12 }
  0x5c   :  { %1715 = shalt.err (!%p1712_p0)
}
  0x5d   :  { %s1716_s30 = scalar_lea.vmem %s1943_s3, 2048  ;;  %p1721_p2 = scmp.lt.s32.totalorder %s1943_s3, %s1943_s3 }
  0x5e   :  { %p1717_p1 = scmp.ne.s32.totalorder %s1943_s3, %s1716_s30  ;;  %p1722_p3 = scmp.lt.s32.totalorder %s1716_s30, %s1716_s30 }
  0x60   :  { %p1723_p4 = por %p1722_p3, %p1721_p2 }
  0x62   :  { %p1724_p5 = pnand %p1723_p4, %p1717_p1 }
  0x64   :  { %1727 = shalt.err (!%p1724_p5)
}
  0x65   :  { %83 = dma.hbm_to_vmem [thread:$0]  %s2117_s4, 2048, %s1943_s3, [#allocation9], %s2130_s16, %s2130_s16, %s1785_s26  }
  0x66   :  { %s1792_s23 = smov [#allocation13]   ;;  %s1793_s25 = smov [#allocation14]  }
  0x67   :  { %s101_s24 = sshll.u32 %s1792_s23, 4  ;;  %s113_s27 = sshll.u32 %s1793_s25, 4  ;;  %s102_s24 = int_to_ptr.vmem [resolvable:$true] %s101_s24  ;;  %s1980_s27 = int_to_ptr.vmem [resolvable:$true] %s113_s27 }
  0x68   :  { %s1728_s15 = scalar_lea.hbm %s2119_s6, 1024 }
  0x69   :  { %p1729_p6 = scmp.ne.s32.totalorder %s2119_s6, %s1728_s15  ;;  %p1732_p7 = scmp.lt.u32.totalorder %s1728_s15, %s2119_s6 }
  0x6b   :  { %p1734_p8 = pnand %p1732_p7, %p1729_p6 }
  0x6d   :  { %1737 = shalt.err (!%p1734_p8)
}
  0x6e   :  { %s1738_s4 = scalar_lea.vmem %s102_s24, 1024  ;;  %p1743_p10 = scmp.lt.s32.totalorder %s102_s24, %s102_s24 }
  0x6f   :  { %p1739_p9 = scmp.ne.s32.totalorder %s102_s24, %s1738_s4  ;;  %p1744_p11 = scmp.lt.s32.totalorder %s1738_s4, %s1738_s4 }
  0x71   :  { %p1745_p12 = por %p1744_p11, %p1743_p10 }
  0x73   :  { %p1746_p13 = pnand %p1745_p12, %p1739_p9 }
  0x75   :  { %1749 = shalt.err (!%p1746_p13)
}
  0x76   :  { %107 = dma.hbm_to_vmem [thread:$0]  %s2119_s6, 1024, %s102_s24, [#allocation12], %s2130_s16, %s2130_s16, %s1785_s26  }
  0x77   :  { %s1750_s1 = scalar_lea.hbm %s2120_s7, 1024 }
  0x78   :  { %p1751_p0 = scmp.ne.s32.totalorder %s2120_s7, %s1750_s1  ;;  %p1754_p1 = scmp.lt.u32.totalorder %s1750_s1, %s2120_s7 }
  0x7a   :  { %p1756_p2 = pnand %p1754_p1, %p1751_p0 }
  0x7c   :  { %1759 = shalt.err (!%p1756_p2)
}
  0x7d   :  { %s1760_s25 = scalar_lea.vmem %s1980_s27, 1024  ;;  %p1765_p4 = scmp.lt.s32.totalorder %s1980_s27, %s1980_s27 }
  0x7e   :  { %p1761_p3 = scmp.ne.s32.totalorder %s1980_s27, %s1760_s25  ;;  %p1766_p5 = scmp.lt.s32.totalorder %s1760_s25, %s1760_s25 }
  0x80   :  { %p1767_p6 = por %p1766_p5, %p1765_p4 }
  0x82   :  { %p1768_p7 = pnand %p1767_p6, %p1761_p3 }
  0x84   :  { %1771 = shalt.err (!%p1768_p7)
}
  0x85   :  { %119 = dma.hbm_to_vmem [thread:$0]  %s2120_s7, 1024, %s1980_s27, [#allocation15], %s2130_s16, %s2130_s16, %s1785_s26  }
  0x86   :  { %1772 = dma.done.wait [#allocation4], 128  }
  0x87   :  { %1773 = vsyncadd [#allocation4], 4294967168 }
  0x88   :  { %1774 = dma.done.wait [#allocation6], 1152  }
  0x89   :  { %1775 = vsyncadd [#allocation6], 4294966144 }
  0x8a   :  { %1776 = dma.done.wait [#allocation9], 4096  }
  0x8b   :  { %1777 = vsyncadd [#allocation9], 4294963200 }
  0x8c   :  { %1778 = dma.done.wait [#allocation12], 2048  }
  0x8d   :  { %1779 = vsyncadd [#allocation12], 4294965248 }
  0x8e   :  { %1780 = dma.done.wait [#allocation15], 1024  }
  0x8f   :  { %1781 = vsyncadd [#allocation15], 4294966272  ;;  %v1794_v0 = vmov 0.0   ;;  %vm1795_vm0 = vmmov 0   ;;  %v1522_v1 = vld [vmem:[#allocation7] sm:$0xff]   ;;  %v1523_v2 = vld [vmem:[#allocation7 + $0x8] sm:$0xff]  }
  0x90   :  { %1391 = vmatprep.subr.bf16.mxu0 %v1794_v0  ;;  %1407 = vmatprep.mubr.msk.bf16.mxu0 %vm1795_vm0, %v1794_v0  ;;  %v1524_v3 = vld [vmem:[#allocation7 + $0x10] sm:$0xff]   ;;  %v1525_v4 = vld [vmem:[#allocation7 + $0x18] sm:$0xff]   ;;  %v1526_v5 = vld [vmem:[#allocation7 + $0x20] sm:$0xff]   ;;  %vm285_vm1 = vcmask 130048   ;;  %v1796_v42 = vmov 0  }
  0x91   :  { %1417 = vmatprep.subr.bf16.mxu1 %v1794_v0  ;;  %1419 = vmatprep.mubr.msk.bf16.mxu1 %vm1795_vm0, %v1794_v0  ;;  %v1527_v6 = vld [vmem:[#allocation7 + $0x28] sm:$0xff]   ;;  %v1528_v7 = vld [vmem:[#allocation7 + $0x30] sm:$0xff]   ;;  %v1529_v8 = vld [vmem:[#allocation7 + $0x38] sm:$0xff]  }
  0x92   :  { %1392 = vmatpush3.bf16.msra.mxu0 %v1522_v1  ;;  %v1530_v9 = vld [vmem:[#allocation5] sm:$0xff]   ;;  %v2033_v15 = vld [vmem:[#allocation3] sm:$0xff]   ;;  %v1534_v25 = vld [vmem:[#allocation8 + $0x4] ss:$8 sps:$4 sm:$0xff]   ;;  %v395_v1 = vlaneseq }
  0x93   :  { %1393 = vmatprep.subr.bf16.mxu0 %v1794_v0  ;;  %v1253_v16 = vld [vmem:[%s2121_s8] ss:$0 sm:$0xff]  ;;  %v1532_v27 = vld [vmem:[#allocation8] ss:$8 sps:$4 sm:$0xff]   ;;  %v1537_v28 = vld [vmem:[#allocation8 + $0x14] ss:$8 sps:$4 sm:$0xff]  }
  0x94   :  { %v1535_v29 = vld [vmem:[#allocation8 + $0x10] ss:$8 sps:$4 sm:$0xff]   ;;  %v1540_v30 = vld [vmem:[#allocation8 + $0x24] ss:$8 sps:$4 sm:$0xff]   ;;  %v1538_v31 = vld [vmem:[#allocation8 + $0x20] ss:$8 sps:$4 sm:$0xff]  }
  0x95   :  { %v1543_v32 = vld [vmem:[#allocation8 + $0x34] ss:$8 sps:$4 sm:$0xff]   ;;  %v1541_v33 = vld [vmem:[#allocation8 + $0x30] ss:$8 sps:$4 sm:$0xff]   ;;  %v1546_v34 = vld [vmem:[#allocation8 + $0x44] ss:$8 sps:$4 sm:$0xff]  }
  0x96   :  { %1394 = vmatpush3.bf16.msra.mxu0 %v1523_v2  ;;  %v1544_v35 = vld [vmem:[#allocation8 + $0x40] ss:$8 sps:$4 sm:$0xff]   ;;  %v1549_v36 = vld [vmem:[#allocation8 + $0x54] ss:$8 sps:$4 sm:$0xff]   ;;  %v1547_v37 = vld [vmem:[#allocation8 + $0x50] ss:$8 sps:$4 sm:$0xff]  }
  0x97   :  { %1395 = vmatprep.subr.bf16.mxu0 %v1794_v0  ;;  %v1552_v38 = vld [vmem:[#allocation8 + $0x64] ss:$8 sps:$4 sm:$0xff]   ;;  %v1550_v39 = vld [vmem:[#allocation8 + $0x60] ss:$8 sps:$4 sm:$0xff]   ;;  %v1555_v40 = vld [vmem:[#allocation8 + $0x74] ss:$8 sps:$4 sm:$0xff]  }
  0x98   :  { %v1553_v41 = vld [vmem:[#allocation8 + $0x70] ss:$8 sps:$4 sm:$0xff]   ;;  %v1556_v43 = vld [vmem:[#allocation10 + $0x40] sm:$0xff]   ;;  %v1558_v45 = vld [vmem:[#allocation10 + $0x48] sm:$0xff]   ;;  %v396_v2 = vshrl.u32 %v395_v1, 7 }
  0x99   :  { %v1557_v44 = vld [vmem:[#allocation10] sm:$0xff]   ;;  %v1559_v46 = vld [vmem:[#allocation10 + $0x8] sm:$0xff]   ;;  %v1560_v47 = vld [vmem:[#allocation10 + $0x50] sm:$0xff]  }
  0x9a   :  { %1396 = vmatpush3.bf16.msra.mxu0 %v1524_v3  ;;  %v1561_v48 = vld [vmem:[#allocation10 + $0x10] sm:$0xff]   ;;  %v1562_v49 = vld [vmem:[#allocation10 + $0x58] sm:$0xff]   ;;  %v1564_v51 = vld [vmem:[#allocation10 + $0x60] sm:$0xff]   ;;  %v397_v3 = vsub.s32 0, %v396_v2 }
  0x9b   :  { %1397 = vmatprep.subr.bf16.mxu0 %v1794_v0  ;;  %v1563_v50 = vld [vmem:[#allocation10 + $0x18] sm:$0xff]   ;;  %v1565_v52 = vld [vmem:[#allocation10 + $0x20] sm:$0xff]   ;;  %v1566_v53 = vld [vmem:[#allocation10 + $0x68] sm:$0xff]  }
  0x9c   :  { %v1567_v59 = vld [vmem:[#allocation10 + $0x28] sm:$0xff]   ;;  %v1568_v60 = vld [vmem:[#allocation10 + $0x70] sm:$0xff]   ;;  %v1570_v62 = vld [vmem:[#allocation10 + $0x78] sm:$0xff]  }
  0x9d   :  { %v1569_v61 = vld [vmem:[#allocation10 + $0x30] sm:$0xff]   ;;  %v1571_v63 = vld [vmem:[#allocation10 + $0x38] sm:$0xff]  }
  0x9e   :  { %1398 = vmatpush3.bf16.msra.mxu0 %v1525_v4  ;;  %v393_v4 = vld [vmem:[%s2122_s9] sm:$0x3] }
  0x9f   :  { %1399 = vmatprep.subr.bf16.mxu0 %v1794_v0 }
  0xa2   :  { %1400 = vmatpush3.bf16.msra.mxu0 %v1526_v5  ;;  %v401_v5 = vsub.s32 1, %v396_v2 }
  0xa3   :  { %1401 = vmatprep.subr.bf16.mxu0 %v1794_v0 }
  0xa6   :  { %1402 = vmatpush3.bf16.msra.mxu0 %v1527_v6  ;;  %v398_v6 = vrot.slane %v393_v4, %v397_v3 }
  0xa7   :  { %1403 = vmatprep.subr.bf16.mxu0 %v1794_v0 }
  0xaa   :  { %1404 = vmatpush3.bf16.msra.mxu0 %v1528_v7  ;;  %v402_v7 = vrot.slane %v393_v4, %v401_v5 }
  0xab   :  { %1405 = vmatprep.subr.bf16.mxu0 %v1794_v0 }
  0xae   :  { %1406 = vmatpush3.bf16.msra.mxu0 %v1529_v8 }
  0xaf   :  { %1411 = vmatprep.subr.bf16.mxu0 %v1794_v0 }
  0xb1   :  { %1408 = vmatmul.mubr.bf16.vlgmr.msra.gmra.mrb[0].mxu0 %v1530_v9 }
  0xb2   :  { %1413 = vmatprep.mubr.msk.bf16.mxu0 %vm1795_vm0, %v1794_v0 }
 0x184   :  { %v265_v10 = vpop.f32.mrb[0].mxu0 }
 0x185   :  { %v1409_v11 = vpop.f32.mrb[1].mxu0 }
 0x186   :  { %v268_v12 = vpop.f32.mrb[2].mxu0 }
 0x187   :  { %v272_v13 = vpack.c.bf16 %v268_v12, %v265_v10  ;;  %v1410_v14 = vpop.f32.mrb[3].mxu0 }
 0x189   :  { %1412 = vmatpush3.bf16.msra.mxu0 %v272_v13 }
 0x18a   :  { %1334 = vmatprep.subr.bf16.mxu0 %v1556_v43 }
 0x18c   :  { %1414 = vmatmul.mubr.msk.bf16.vlgmr.msra.gmra.mrb[4].mxu0 %vm285_vm1, %v2033_v15 }
 0x18d   :  { %1335 = vmatpush3.bf16.msra.mxu0 %v1557_v44 }
 0x18e   :  { %1336 = vmatprep.subr.bf16.mxu0 %v1558_v45 }
 0x191   :  { %1337 = vmatpush3.bf16.msra.mxu0 %v1559_v46 }
 0x192   :  { %1338 = vmatprep.subr.bf16.mxu0 %v1560_v47 }
 0x195   :  { %1339 = vmatpush3.bf16.msra.mxu0 %v1561_v48 }
 0x196   :  { %1340 = vmatprep.subr.bf16.mxu0 %v1562_v49 }
 0x199   :  { %1341 = vmatpush3.bf16.msra.mxu0 %v1563_v50 }
 0x19a   :  { %1342 = vmatprep.subr.bf16.mxu0 %v1564_v51 }
 0x19d   :  { %1343 = vmatpush3.bf16.msra.mxu0 %v1565_v52 }
 0x19e   :  { %1344 = vmatprep.subr.bf16.mxu0 %v1566_v53  ;;  %v1580_v53 = vld [vmem:[#allocation13] sm:$0xff]  }
 0x1a1   :  { %1345 = vmatpush3.bf16.msra.mxu0 %v1567_v59  ;;  %v1586_v59 = vld [vmem:[#allocation13 + $0x30] sm:$0xff]  }
 0x1a2   :  { %1346 = vmatprep.subr.bf16.mxu0 %v1568_v60  ;;  %v1587_v60 = vld [vmem:[#allocation13 + $0x38] sm:$0xff]  }
 0x1a5   :  { %1347 = vmatpush3.bf16.msra.mxu0 %v1569_v61  ;;  %v1299_v61 = vld [vmem:[%s2124_s11] ss:$0 sm:$0xff] }
 0x1a6   :  { %1348 = vmatprep.subr.bf16.mxu0 %v1570_v62 }
 0x1a9   :  { %1349 = vmatpush3.bf16.msra.mxu0 %v1571_v63 }
 0x1aa   :  { %1449 = vmatprep.subr.bf16.mxu0 %v1794_v0 }
 0x25f   :  { %v323_v17 = vpop.f32.mrb[4].mxu0 }
 0x260   :  { %v324_v18 = vadd.f32 %v1253_v16, %v323_v17  ;;  %v1415_v19 = vpop.f32.mrb[5].mxu0 }
 0x261   :  { %v326_v20 = vpop.f32.mrb[6].mxu0 }
 0x262   :  { %v327_v21 = vadd.f32 %v1253_v16, %v326_v20  ;;  %v1416_v22 = vpop.f32.mrb[7].mxu0  ;;  %v330_v23 = vmax.f32 %v324_v18, 0.0 }
 0x264   :  { %v331_v24 = vmax.f32 %v327_v21, 0.0 }
 0x266   :  { %v332_v26 = vpack.c.bf16 %v331_v24, %v330_v23 }
 0x268   :  { %1418 = vmatpush3.bf16.msra.mxu1 %v332_v26 }
 0x269   :  { %485 = vmatprep.subr.bf16.mxu1 %v1534_v25 }
 0x26b   :  { %1420 = vmatmul.mubr.msk.bf16.vlgmr.msra.gmra.mrb[0].mxu1 %vm285_vm1, %v2033_v15 }
 0x26c   :  { %486 = vmatpush1.bf16.msra.mxu1 %v1532_v27  ;;  %517 = vmatprep.mubr.bf16.mxu1 %v1796_v42 }
 0x26d   :  { %487 = vmatprep.subr.bf16.mxu1 %v1537_v28 }
 0x270   :  { %488 = vmatpush1.bf16.msra.mxu1 %v1535_v29 }
 0x271   :  { %489 = vmatprep.subr.bf16.mxu1 %v1540_v30  ;;  %v1572_v30 = vld [vmem:[#allocation11] sm:$0xff]  }
 0x274   :  { %490 = vmatpush1.bf16.msra.mxu1 %v1538_v31  ;;  %v1573_v31 = vld [vmem:[#allocation11 + $0x8] sm:$0xff]  }
 0x275   :  { %491 = vmatprep.subr.bf16.mxu1 %v1543_v32  ;;  %v1574_v32 = vld [vmem:[#allocation11 + $0x10] sm:$0xff]  }
 0x278   :  { %492 = vmatpush1.bf16.msra.mxu1 %v1541_v33  ;;  %v1575_v33 = vld [vmem:[#allocation11 + $0x18] sm:$0xff]  }
 0x279   :  { %493 = vmatprep.subr.bf16.mxu1 %v1546_v34  ;;  %v1576_v34 = vld [vmem:[#allocation11 + $0x20] sm:$0xff]  }
 0x27c   :  { %494 = vmatpush1.bf16.msra.mxu1 %v1544_v35  ;;  %v1577_v35 = vld [vmem:[#allocation11 + $0x28] sm:$0xff]  }
 0x27d   :  { %495 = vmatprep.subr.bf16.mxu1 %v1549_v36  ;;  %v1578_v36 = vld [vmem:[#allocation11 + $0x30] sm:$0xff]  }
 0x280   :  { %496 = vmatpush1.bf16.msra.mxu1 %v1547_v37  ;;  %v1579_v37 = vld [vmem:[#allocation11 + $0x38] sm:$0xff]  }
 0x281   :  { %497 = vmatprep.subr.bf16.mxu1 %v1552_v38  ;;  %v1289_v38 = vld [vmem:[%s2123_s10] ss:$0 sm:$0xff] }
 0x284   :  { %498 = vmatpush1.bf16.msra.mxu1 %v1550_v39 }
 0x285   :  { %499 = vmatprep.subr.bf16.mxu1 %v1555_v40 }
 0x288   :  { %500 = vmatpush1.bf16.msra.mxu1 %v1553_v41 }
 0x289   :  { %1423 = vmatprep.subr.bf16.mxu1 %v1794_v0 }
 0x33e   :  { %v385_v54 = vpop.f32.mrb[0].mxu1 }
 0x33f   :  { %v1421_v55 = vpop.f32.mrb[1].mxu1 }
 0x340   :  { %v388_v56 = vpop.f32.mrb[2].mxu1  ;;  %v1582_v55 = vld [vmem:[#allocation13 + $0x10] sm:$0xff]  }
 0x341   :  { %v392_v57 = vpack.c.bf16 %v388_v56, %v385_v54  ;;  %v1422_v58 = vpop.f32.mrb[3].mxu1  ;;  %v1581_v54 = vld [vmem:[#allocation13 + $0x8] sm:$0xff]   ;;  %v1583_v56 = vld [vmem:[#allocation13 + $0x18] sm:$0xff]  }
 0x342   :  { %v1585_v58 = vld [vmem:[#allocation13 + $0x28] sm:$0xff]  }
 0x343   :  { %518 = vmatmul.mubr.bf16.vlgmr.msra.gmra.mrb[4].mxu1 %v392_v57  ;;  %v1584_v57 = vld [vmem:[#allocation13 + $0x20] sm:$0xff]  }
 0x344   :  { %1425 = vmatprep.mubr.msk.bf16.mxu1 %vm1795_vm0, %v1794_v0 }
 0x416   :  { %v519_v8 = vpop.f32.mrb[4].mxu1 }
 0x417   :  { %v520_v9 = vadd.f32 %v519_v8, %v398_v6  ;;  %v521_v10 = vpop.f32.mrb[5].mxu1 }
 0x418   :  { %v522_v11 = vadd.f32 %v521_v10, %v402_v7  ;;  %v523_v12 = vpop.f32.mrb[6].mxu1 }
 0x419   :  { %v524_v13 = vadd.f32 %v523_v12, %v398_v6  ;;  %v525_v14 = vpop.f32.mrb[7].mxu1  ;;  %v528_v17 = vmax.f32 %v520_v9, 0.0 }
 0x41a   :  { %v526_v16 = vadd.f32 %v525_v14, %v402_v7  ;;  %v529_v19 = vmax.f32 %v522_v11, 0.0  ;;  %v1589_v14 = vld [vmem:[#allocation14 + $0x8] sm:$0xff]  }
 0x41b   :  { %v530_v18 = vmax.f32 %v524_v13, 0.0  ;;  %v1588_v13 = vld [vmem:[#allocation14] sm:$0xff]  }
 0x41c   :  { %v531_v20 = vmax.f32 %v526_v16, 0.0  ;;  %v1590_v16 = vld [vmem:[#allocation14 + $0x10] sm:$0xff]  }
 0x41d   :  { %v532_v21 = vpack.c.bf16 %v530_v18, %v528_v17  ;;  %v1591_v17 = vld [vmem:[#allocation14 + $0x18] sm:$0xff]   ;;  %v1592_v18 = vld [vmem:[#allocation14 + $0x20] sm:$0xff]  }
 0x41e   :  { %v533_v22 = vpack.c.bf16 %v531_v20, %v529_v19  ;;  %v1593_v19 = vld [vmem:[#allocation14 + $0x28] sm:$0xff]   ;;  %v1594_v20 = vld [vmem:[#allocation14 + $0x30] sm:$0xff]  }
 0x420   :  { %698 = vmatprep.mubr.bf16.mxu0 %v533_v22  ;;  %v1309_v22 = vld [vmem:[%s2125_s12] ss:$0 sm:$0xff] }
 0x421   :  { %699 = vmatmul.mubr.bf16.vlgmr.msra.gmra.mrb[8].mxu0 %v532_v21  ;;  %v1595_v21 = vld [vmem:[#allocation14 + $0x38] sm:$0xff]  }
 0x422   :  { %1451 = vmatprep.mubr.msk.bf16.mxu0 %vm1795_vm0, %v1794_v0 }
 0x4f4   :  { %v1350_v23 = vpop.f32.mrb[8].mxu0 }
 0x4f5   :  { %v1351_v24 = vpop.f32.mrb[9].mxu0 }
 0x4f6   :  { %v1352_v25 = vadd.f32 %v1351_v24, %v1350_v23  ;;  %v1353_v26 = vpop.f32.mrb[10].mxu0 }
 0x4f7   :  { %v1354_v27 = vpop.f32.mrb[11].mxu0 }
 0x4f8   :  { %v1355_v28 = vadd.f32 %v1354_v27, %v1353_v26 }
 0x4fa   :  { %v707_v29 = vpack.c.bf16 %v1355_v28, %v1352_v25 }
 0x4fc   :  { %1424 = vmatpush3.bf16.msra.mxu1 %v707_v29 }
 0x4fd   :  { %1429 = vmatprep.subr.bf16.mxu1 %v1794_v0 }
 0x4ff   :  { %1426 = vmatmul.mubr.msk.bf16.vlgmr.msra.gmra.mrb[8].mxu1 %vm285_vm1, %v2033_v15 }
 0x500   :  { %1430 = vmatpush3.bf16.msra.mxu1 %v1572_v30  ;;  %1445 = vmatprep.mubr.msk.bf16.mxu1 %vm1795_vm0, %v1794_v0 }
 0x501   :  { %1431 = vmatprep.subr.bf16.mxu1 %v1794_v0 }
 0x504   :  { %1432 = vmatpush3.bf16.msra.mxu1 %v1573_v31 }
 0x505   :  { %1433 = vmatprep.subr.bf16.mxu1 %v1794_v0 }
 0x508   :  { %1434 = vmatpush3.bf16.msra.mxu1 %v1574_v32 }
 0x509   :  { %1435 = vmatprep.subr.bf16.mxu1 %v1794_v0 }
 0x50c   :  { %1436 = vmatpush3.bf16.msra.mxu1 %v1575_v33 }
 0x50d   :  { %1437 = vmatprep.subr.bf16.mxu1 %v1794_v0 }
 0x510   :  { %1438 = vmatpush3.bf16.msra.mxu1 %v1576_v34 }
 0x511   :  { %1439 = vmatprep.subr.bf16.mxu1 %v1794_v0 }
 0x514   :  { %1440 = vmatpush3.bf16.msra.mxu1 %v1577_v35 }
 0x515   :  { %1441 = vmatprep.subr.bf16.mxu1 %v1794_v0 }
 0x518   :  { %1442 = vmatpush3.bf16.msra.mxu1 %v1578_v36  ;;  %v1319_v36 = vld [vmem:[%s2126_s13] ss:$0 sm:$0xff] }
 0x519   :  { %1443 = vmatprep.subr.bf16.mxu1 %v1794_v0 }
 0x51c   :  { %1444 = vmatpush3.bf16.msra.mxu1 %v1579_v37 }
 0x51d   :  { %1475 = vmatprep.subr.bf16.mxu1 %v1794_v0 }
 0x5d2   :  { %v749_v39 = vpop.f32.mrb[8].mxu1 }
 0x5d3   :  { %v750_v40 = vadd.f32 %v1289_v38, %v749_v39  ;;  %v1427_v41 = vpop.f32.mrb[9].mxu1 }
 0x5d4   :  { %v752_v42 = vpop.f32.mrb[10].mxu1 }
 0x5d5   :  { %v753_v43 = vadd.f32 %v1289_v38, %v752_v42  ;;  %v1428_v44 = vpop.f32.mrb[11].mxu1  ;;  %v756_v45 = vmax.f32 %v750_v40, 0.0 }
 0x5d7   :  { %v757_v46 = vmax.f32 %v753_v43, 0.0 }
 0x5d9   :  { %v758_v47 = vpack.c.bf16 %v757_v46, %v756_v45 }
 0x5db   :  { %1446 = vmatmul.mubr.bf16.vlgmr.msra.gmra.mrb[12].mxu1 %v758_v47 }
 0x5dc   :  { %1477 = vmatprep.mubr.msk.bf16.mxu1 %vm1795_vm0, %v1794_v0 }
 0x6ae   :  { %v859_v48 = vpop.f32.mrb[12].mxu1 }
 0x6af   :  { %v1447_v49 = vpop.f32.mrb[13].mxu1 }
 0x6b0   :  { %v862_v50 = vpop.f32.mrb[14].mxu1 }
 0x6b1   :  { %v866_v51 = vpack.c.bf16 %v862_v50, %v859_v48  ;;  %v1448_v52 = vpop.f32.mrb[15].mxu1 }
 0x6b3   :  { %1450 = vmatpush3.bf16.msra.mxu0 %v866_v51 }
 0x6b4   :  { %1455 = vmatprep.subr.bf16.mxu0 %v1794_v0 }
 0x6b6   :  { %1452 = vmatmul.mubr.msk.bf16.vlgmr.msra.gmra.mrb[12].mxu0 %vm285_vm1, %v2033_v15 }
 0x6b7   :  { %1456 = vmatpush3.bf16.msra.mxu0 %v1580_v53  ;;  %1471 = vmatprep.mubr.msk.bf16.mxu0 %vm1795_vm0, %v1794_v0 }
 0x6b8   :  { %1457 = vmatprep.subr.bf16.mxu0 %v1794_v0 }
 0x6bb   :  { %1458 = vmatpush3.bf16.msra.mxu0 %v1581_v54 }
 0x6bc   :  { %1459 = vmatprep.subr.bf16.mxu0 %v1794_v0 }
 0x6bf   :  { %1460 = vmatpush3.bf16.msra.mxu0 %v1582_v55 }
 0x6c0   :  { %1461 = vmatprep.subr.bf16.mxu0 %v1794_v0 }
 0x6c3   :  { %1462 = vmatpush3.bf16.msra.mxu0 %v1583_v56 }
 0x6c4   :  { %1463 = vmatprep.subr.bf16.mxu0 %v1794_v0 }
 0x6c7   :  { %1464 = vmatpush3.bf16.msra.mxu0 %v1584_v57 }
 0x6c8   :  { %1465 = vmatprep.subr.bf16.mxu0 %v1794_v0 }
 0x6cb   :  { %1466 = vmatpush3.bf16.msra.mxu0 %v1585_v58 }
 0x6cc   :  { %1467 = vmatprep.subr.bf16.mxu0 %v1794_v0 }
 0x6cf   :  { %1468 = vmatpush3.bf16.msra.mxu0 %v1586_v59 }
 0x6d0   :  { %1469 = vmatprep.subr.bf16.mxu0 %v1794_v0 }
 0x6d3   :  { %1470 = vmatpush3.bf16.msra.mxu0 %v1587_v60 }
 0x6d4   :  { %1501 = vmatprep.subr.bf16.mxu0 %v1794_v0 }
 0x789   :  { %v908_v62 = vpop.f32.mrb[12].mxu0 }
 0x78a   :  { %v909_v63 = vadd.f32 %v1299_v61, %v908_v62  ;;  %v1453_v1 = vpop.f32.mrb[13].mxu0 }
 0x78b   :  { %v911_v2 = vpop.f32.mrb[14].mxu0 }
 0x78c   :  { %v912_v3 = vadd.f32 %v1299_v61, %v911_v2  ;;  %v1454_v4 = vpop.f32.mrb[15].mxu0  ;;  %v915_v5 = vmax.f32 %v909_v63, 0.0 }
 0x78e   :  { %v916_v6 = vmax.f32 %v912_v3, 0.0 }
 0x790   :  { %v917_v7 = vpack.c.bf16 %v916_v6, %v915_v5 }
 0x792   :  { %1472 = vmatmul.mubr.bf16.vlgmr.msra.gmra.mrb[16].mxu0 %v917_v7 }
 0x793   :  { %1503 = vmatprep.mubr.msk.bf16.mxu0 %vm1795_vm0, %v1794_v0 }
 0x865   :  { %v1018_v8 = vpop.f32.mrb[16].mxu0 }
 0x866   :  { %v1473_v9 = vpop.f32.mrb[17].mxu0 }
 0x867   :  { %v1021_v10 = vpop.f32.mrb[18].mxu0 }
 0x868   :  { %v1025_v11 = vpack.c.bf16 %v1021_v10, %v1018_v8  ;;  %v1474_v12 = vpop.f32.mrb[19].mxu0 }
 0x86a   :  { %1476 = vmatpush3.bf16.msra.mxu1 %v1025_v11 }
 0x86b   :  { %1481 = vmatprep.subr.bf16.mxu1 %v1794_v0 }
 0x86d   :  { %1478 = vmatmul.mubr.msk.bf16.vlgmr.msra.gmra.mrb[16].mxu1 %vm285_vm1, %v2033_v15 }
 0x86e   :  { %1482 = vmatpush3.bf16.msra.mxu1 %v1588_v13  ;;  %1497 = vmatprep.mubr.msk.bf16.mxu1 %vm1795_vm0, %v1794_v0 }
 0x86f   :  { %1483 = vmatprep.subr.bf16.mxu1 %v1794_v0 }
 0x872   :  { %1484 = vmatpush3.bf16.msra.mxu1 %v1589_v14 }
 0x873   :  { %1485 = vmatprep.subr.bf16.mxu1 %v1794_v0 }
 0x876   :  { %1486 = vmatpush3.bf16.msra.mxu1 %v1590_v16 }
 0x877   :  { %1487 = vmatprep.subr.bf16.mxu1 %v1794_v0 }
 0x87a   :  { %1488 = vmatpush3.bf16.msra.mxu1 %v1591_v17 }
 0x87b   :  { %1489 = vmatprep.subr.bf16.mxu1 %v1794_v0 }
 0x87e   :  { %1490 = vmatpush3.bf16.msra.mxu1 %v1592_v18 }
 0x87f   :  { %1491 = vmatprep.subr.bf16.mxu1 %v1794_v0 }
 0x882   :  { %1492 = vmatpush3.bf16.msra.mxu1 %v1593_v19 }
 0x883   :  { %1493 = vmatprep.subr.bf16.mxu1 %v1794_v0 }
 0x886   :  { %1494 = vmatpush3.bf16.msra.mxu1 %v1594_v20 }
 0x887   :  { %1495 = vmatprep.subr.bf16.mxu1 %v1794_v0 }
 0x88a   :  { %1496 = vmatpush3.bf16.msra.mxu1 %v1595_v21 }
 0x940   :  { %v1067_v23 = vpop.f32.mrb[16].mxu1 }
 0x941   :  { %v1068_v24 = vadd.f32 %v1309_v22, %v1067_v23  ;;  %v1479_v25 = vpop.f32.mrb[17].mxu1 }
 0x942   :  { %v1070_v26 = vpop.f32.mrb[18].mxu1 }
 0x943   :  { %v1071_v27 = vadd.f32 %v1309_v22, %v1070_v26  ;;  %v1480_v28 = vpop.f32.mrb[19].mxu1  ;;  %v1074_v29 = vmax.f32 %v1068_v24, 0.0 }
 0x945   :  { %v1075_v30 = vmax.f32 %v1071_v27, 0.0 }
 0x947   :  { %v1076_v31 = vpack.c.bf16 %v1075_v30, %v1074_v29 }
 0x949   :  { %1498 = vmatmul.mubr.bf16.vlgmr.msra.gmra.mrb[20].mxu1 %v1076_v31 }
 0xa1c   :  { %v1177_v32 = vpop.f32.mrb[20].mxu1 }
 0xa1d   :  { %v1499_v33 = vpop.f32.mrb[21].mxu1 }
 0xa1e   :  { %v1180_v34 = vpop.f32.mrb[22].mxu1 }
 0xa1f   :  { %v1184_v0 = vpack.c.bf16 %v1180_v34, %v1177_v32  ;;  %v1500_v35 = vpop.f32.mrb[23].mxu1 }
 0xa21   :  { %1502 = vmatpush3.bf16.msra.mxu0 %v1184_v0 }
 0xa24   :  { %1504 = vmatmul.mubr.msk.bf16.vlgmr.msra.gmra.mrb[20].mxu0 %vm285_vm1, %v2033_v15 }
 0xaf7   :  { %v1226_v37 = vpop.f32.mrb[20].mxu0 }
 0xaf8   :  { %v1227_v38 = vadd.f32 %v1319_v36, %v1226_v37  ;;  %v1505_v39 = vpop.f32.mrb[21].mxu0 }
 0xaf9   :  { %v1229_v40 = vpop.f32.mrb[22].mxu0 }
 0xafa   :  { %1233 = vst [vmem:[%s2127_s14] sm:$0xff] %v1227_v38  ;;  %v1230_v41 = vadd.f32 %v1319_v36, %v1229_v40  ;;  %v1506_v42 = vpop.f32.mrb[23].mxu0 }
 0xafc   :  { %1234 = vst [vmem:[%s2127_s14 + $0x8] sm:$0xff] %v1230_v41 }
 0xafd   :  { %1239 = vsyncpa [#allocation4], 1 }
 0xafe   :  { %1240 = vsyncpa [#allocation6], 1 }
 0xaff   :  { %1241 = vsyncpa [#allocation9], 1 }
 0xb00   :  { %1242 = vsyncpa [#allocation12], 1 }
 0xb01   :  { %1243 = vsyncpa [#allocation15], 1 }

</bundles_post_ra>
